<compile_context>
chip_gen: v5e
topology: v5e:2x2
jax: 0.10.0
libtpu: 0.0.40
codegen_flags: <defaults>
</compile_context>

<pallas_src>
import jax
import jax.numpy as jnp
from jax.experimental import pallas as pl
from jax.experimental.pallas import tpu as pltpu


def _round_up(v, m):
    return (v + m - 1) // m * m


def model_kernel(a_ref, x_ref, o_ref):
    # a_ref: (M*N, N*K) folded weight (grid-invariant).
    # x_ref: (N*K, TB)  batch-on-lanes input slab.
    # o_ref: (M*N, TB)  batch-on-lanes output slab.
    o_ref[...] = jnp.dot(
        a_ref[...], x_ref[...],
        preferred_element_type=jnp.float32).astype(o_ref.dtype)


def _vmem_plan(nk, mn, itemsize, B):
    """Padding-aware batch-tile (TB) and VMEM-limit choice, per chip generation."""
    try:
        cap = pltpu.get_tpu_info().vmem_capacity_bytes
    except Exception:
        cap = 64 * 1024 * 1024                 # conservative default (v7x-sized)
    if cap >= 96 * 1024 * 1024:                # v5e / v6e: 128 MiB physical VMEM
        tile_budget = 48 * 1024 * 1024
        vmem_limit = 96 * 1024 * 1024
    else:                                      # v7x: 64 MiB physical VMEM
        tile_budget = 24 * 1024 * 1024
        vmem_limit = 44 * 1024 * 1024

    # (8,128)-padded footprints of the double-buffered blocks.
    nk_pad = _round_up(nk, 8)                  # sublane padding of (nk, TB) block
    mn_pad = _round_up(mn, 8)                  # sublane padding of (mn, TB) block
    a_bytes = 2 * mn_pad * _round_up(nk, 128) * itemsize
    per_lane = 2 * (nk_pad + mn_pad) * itemsize
    avail = max(tile_budget - a_bytes, per_lane * 128)
    tb_max = max(128, (avail // per_lane) // 128 * 128)

    lanes = _round_up(B, 128)
    tb = min(tb_max, lanes)
    # Keep at least two grid steps when there is enough batch: negligible cost
    # on 1-TC chips, lets the "parallel" axis shard across v7x's two TCs.
    if lanes >= 256 and tb >= lanes:
        tb = _round_up(pl.cdiv(lanes, 2), 128)
    b_pad = _round_up(B, tb)
    return tb, b_pad, vmem_limit


def model_forward(x, w):
    B, N, K = x.shape
    M, K2 = w.shape
    if K != K2:
        raise ValueError(f"in_features mismatch: x has K={K}, W has K={K2}")
    if N != K:
        # PyTorch's `v1 * W` broadcast ((B, M, N) * (M, K)) requires N == K,
        # as in the spec module (Linear(2, 2) on a (1, 2, 2) input).
        raise ValueError(f"`v1 * W` requires N == in_features, got N={N}, K={K}")

    itemsize = jnp.dtype(x.dtype).itemsize
    nk, mn = N * K, M * N
    tb, b_pad, vmem_limit = _vmem_plan(nk, mn, itemsize, B)
    grid = (b_pad // tb,)

    # Fold "linear then scale-by-W" into one (M*N, N*K) matrix:
    #   A[m*N + n, n'*K + k] = W[m, n] * W[m, k] * (n' == n)
    # so out[m*N + n, b] = W[m, n] * sum_k W[m, k] * x[b, n, k].
    w32 = w.astype(jnp.float32)
    a3 = w32[:, :, None] * w32[:, None, :]                    # (M, N, K)
    eye = jnp.eye(N, dtype=jnp.float32)
    A = (a3[:, :, None, :] * eye[None, :, :, None]).reshape(mn, nk).astype(w.dtype)

    # Batch-on-lanes layout: xf[n*K + k, b] = x[b, n, k], zero-padded to b_pad.
    xf = jnp.transpose(x, (1, 2, 0)).reshape(nk, B)
    if b_pad != B:
        xf = jnp.pad(xf, ((0, 0), (0, b_pad - B)))

    cost = pl.CostEstimate(
        flops=2 * B * M * N * K + B * M * N,
        transcendentals=0,
        bytes_accessed=(B * N * K + M * K + B * M * N) * itemsize,
    )

    out_flat = pl.pallas_call(
        model_kernel,
        out_shape=jax.ShapeDtypeStruct((mn, b_pad), x.dtype),
        grid_spec=pltpu.PrefetchScalarGridSpec(
            num_scalar_prefetch=0,
            grid=grid,
            in_specs=[
                pl.BlockSpec((mn, nk), lambda i: (0, 0)),   # folded weight (invariant)
                pl.BlockSpec((nk, tb), lambda i: (0, i)),   # batch tile (lane-dense)
            ],
            out_specs=pl.BlockSpec((mn, tb), lambda i: (0, i)),
        ),
        compiler_params=pltpu.CompilerParams(
            dimension_semantics=("parallel",),
            vmem_limit_bytes=vmem_limit),
        cost_estimate=cost,
    )(A, xf)

    # (M*N, B) -> (M, N, B) -> (B, M, N)
    return jnp.transpose(out_flat[:, :B].reshape(M, N, B), (2, 0, 1))


def _reference(x, w):
    v0 = jnp.einsum('bnk,mk->bnm', x, w)        # F.linear(input, W), no bias
    return jnp.transpose(v0, (0, 2, 1)) * w     # permute(0, 2, 1) * W


if __name__ == "__main__":
    key = jax.random.PRNGKey(0)
    kx, kw, kx2, kw2, kx3, kw3 = jax.random.split(key, 6)

    # Module-implied shapes: input (1, 2, 2), Linear(2, 2) weight (2, 2).
    x = jax.random.normal(kx, (1, 2, 2), dtype=jnp.float32)
    bound = 1.0 / (2.0 ** 0.5)
    w = jax.random.uniform(kw, (2, 2), dtype=jnp.float32,
                           minval=-bound, maxval=bound)
    out = jax.block_until_ready(model_forward(x, w))
    ref = _reference(x, w)
    assert out.shape == ref.shape == (1, 2, 2)
    assert jnp.allclose(out, ref, atol=1e-5, rtol=1e-5)

    # Secondary check: larger feature size (Linear(8, 8) on (16, 8, 8)).
    x2 = jax.random.normal(kx2, (16, 8, 8), dtype=jnp.float32)
    b2 = 1.0 / (8.0 ** 0.5)
    w2 = jax.random.uniform(kw2, (8, 8), dtype=jnp.float32,
                            minval=-b2, maxval=b2)
    out2 = jax.block_until_ready(model_forward(x2, w2))
    ref2 = _reference(x2, w2)
    assert out2.shape == ref2.shape == (16, 8, 8)
    assert jnp.allclose(out2, ref2, atol=1e-4, rtol=1e-5)

    # Third check: large batch exercises grid > 1 (multi-step, dual-TC path).
    x3 = jax.random.normal(kx3, (512, 4, 4), dtype=jnp.float32)
    b3 = 1.0 / (4.0 ** 0.5)
    w3 = jax.random.uniform(kw3, (4, 4), dtype=jnp.float32,
                            minval=-b3, maxval=b3)
    out3 = jax.block_until_ready(model_forward(x3, w3))
    ref3 = _reference(x3, w3)
    assert out3.shape == ref3.shape == (512, 4, 4)
    assert jnp.allclose(out3, ref3, atol=1e-4, rtol=1e-5)

    print("KERNEL_OK")
</pallas_src>

<mosaic_0001>
module attributes {stable_mosaic.version = 11 : i64} {
  func.func @model_kernel(%arg0: i32, %arg1: memref<4x4xf32, #tpu.memory_space<vmem>>, %arg2: memref<4x128xf32, #tpu.memory_space<vmem>>, %arg3: memref<4x128xf32, #tpu.memory_space<vmem>>) attributes {dimension_semantics = [#tpu.dimension_semantics<parallel>], iteration_bounds = array<i64: 1>, scalar_prefetch = 0 : i64, scratch_operands = 0 : i64, tpu.core_type = #tpu.core_type<tc>, window_params = [{pipeline_mode = #tpu.pipeline_mode<synchronous>, transform_indices = @transform_0, window_bounds = array<i64: 4, 4>}, {transform_indices = @transform_1, window_bounds = array<i64: 4, 128>}, {transform_indices = @transform_2, window_bounds = array<i64: 4, 128>}]} {
    %c0 = arith.constant 0 : index
    %c0_0 = arith.constant 0 : index
    %0 = vector.load %arg1[%c0, %c0_0] : memref<4x4xf32, #tpu.memory_space<vmem>>, vector<4x4xf32>
    %c0_1 = arith.constant 0 : index
    %c0_2 = arith.constant 0 : index
    %1 = vector.load %arg2[%c0_1, %c0_2] : memref<4x128xf32, #tpu.memory_space<vmem>>, vector<4x128xf32>
    %cst = arith.constant dense<0.000000e+00> : vector<4x128xf32>
    %2 = tpu.matmul %0, %1, %cst {dimension_numbers = #tpu.dot_dimension_numbers<[1], [0], [0], [1], [0, 0, 1, 1], [], []>} : vector<4x4xf32>, vector<4x128xf32>, vector<4x128xf32> -> vector<4x128xf32>
    %c0_3 = arith.constant 0 : index
    %c0_4 = arith.constant 0 : index
    %3 = vector.load %arg3[%c0_3, %c0_4] : memref<4x128xf32, #tpu.memory_space<vmem>>, vector<4x128xf32>
    tpu.vector_store %arg3[%c0_3, %c0_4], %2 {strides = array<i32>} : memref<4x128xf32, #tpu.memory_space<vmem>>, vector<4x128xf32>,
    return
  }
  func.func @transform_0(%arg0: i32) -> (i32, i32) {
    %c0_i32 = arith.constant 0 : i32
    %c0_i32_0 = arith.constant 0 : i32
    %c0_i32_1 = arith.constant 0 : i32
    return %c0_i32, %c0_i32_0 : i32, i32
  }
  func.func @transform_1(%arg0: i32) -> (i32, i32) {
    %c0_i32 = arith.constant 0 : i32
    %c0_i32_0 = arith.constant 0 : i32
    return %c0_i32, %arg0 : i32, i32
  }
  func.func @transform_2(%arg0: i32) -> (i32, i32) {
    %c0_i32 = arith.constant 0 : i32
    %c0_i32_0 = arith.constant 0 : i32
    return %c0_i32, %arg0 : i32, i32
  }
}

</mosaic_0001>

<bundles_post_ra>
// kernel: tpu_custom_call.1
= control target key start
LH: loop header
LB: loop body
LE: loop exit
PB: predicated region body
PF: predicated region fallthrough
CT: control target
= control target key end

     0   :  { %7 = vsyncpa [#allocation3], 0  ;;  %s199_s0 = inlined_call_operand.hbm [shape: f32[4,4], index: 0, kind: input, shape index: {}]   ;;  %s200_s1 = inlined_call_operand.hbm [shape: f32[4,128], index: 1, kind: input, shape index: {}]   ;;  %s201_s2 = inlined_call_operand.hbm [shape: f32[4,128], index: 2, kind: output, shape index: {}]  }
   0x1   :  { %8 = vsyncpa [#allocation6], 0 }
   0x2   :  { %9 = vsyncpa [#allocation4], 0  ;;  %s15_s11 = sshll.u32 %s199_s0, 4  ;;  %s172_s12 = smov [#allocation2]   ;;  %s16_s11 = int_to_ptr.hbm [resolvable:$true] %s15_s11 }
   0x3   :  { %s17_s13 = sshll.u32 %s172_s12, 4  ;;  %s26_s16 = sshll.u32 %s200_s1, 4  ;;  %s18_s13 = int_to_ptr.vmem [resolvable:$true] %s17_s13  ;;  %s27_s16 = int_to_ptr.hbm [resolvable:$true] %s26_s16 }
   0x4   :  { %20 = dma.hbm_to_vmem [thread:$0]  %s16_s11, 64, %s18_s13, [#allocation3]  }
   0x5   :  { %s173_s17 = smov [#allocation5]  }
   0x6   :  { %s28_s18 = sshll.u32 %s173_s17, 4  ;;  %s29_s18 = int_to_ptr.vmem [resolvable:$true] %s28_s18 }
   0x7   :  { %31 = dma.hbm_to_vmem [thread:$0]  %s27_s16, 64, %s29_s18, [#allocation6]  }
   0x8   :  { %166 = dma.done.wait [#allocation3], 64  }
   0x9   :  { %167 = vsyncadd [#allocation3], 4294967232 }
   0xa   :  { %168 = dma.done.wait [#allocation6], 64  }
   0xb   :  { %169 = vsyncadd [#allocation6], 4294967232  ;;  %vm46_vm0 = vcmask 1043456   ;;  %vm42_vm1 = vcmask 31744   ;;  %v41_v0 = vld [vmem:[#allocation5] sm:$0xf] }
   0xc   :  { %v40_v1 = vld [vmem:[#allocation2] sm:$0xf]  ;;  %89 = vmatpush.msk.msra.mxu0 %vm46_vm0, %v41_v0  ;;  %s174_s0 = smov [#allocation7]   ;;  %s78_s21 = sshll.u32 %s201_s2, 4  ;;  %s79_s21 = int_to_ptr.hbm [resolvable:$true] %s78_s21 }
   0xd   :  { %90 = vmatmul.msk.f32.vlgmr.msra.gmra.mxu0 %vm42_vm1, %v40_v1  ;;  %s76_s19 = sshll.u32 %s174_s0, 4  ;;  %s77_s19 = int_to_ptr.vmem [resolvable:$true] %s76_s19 }
  0x8a   :  { %v67_v2 = vpop.f32.mrf.mxu0 }
  0x8b   :  { %70 = vst [vmem:[#allocation7] sm:$0xf] %v67_v2 }
  0x8c   :  { %81 = dma.vmem_to_hbm [thread:$0]  %s77_s19, 64, %s79_s21, [#allocation4]  }
  0x8d   :  { %170 = dma.done.wait [#allocation4], 64  }
  0x8e   :  { %171 = vsyncadd [#allocation4], 4294967232 }
  0x8f   :  { %86 = vsyncpa [#allocation3], 1 }
  0x90   :  { %87 = vsyncpa [#allocation6], 1 }
  0x91   :  { %88 = vsyncpa [#allocation4], 1 }

</bundles_post_ra>
